<compile_context>
chip_gen: v7x
topology: tpu7x:2x2x1
jax: 0.10.0
libtpu: 0.0.40
codegen_flags: <defaults>
</compile_context>

<pallas_src>
import jax
import jax.numpy as jnp
from jax.experimental import pallas as pl
from jax.experimental.pallas import tpu as pltpu


def _pad128(n):
    return ((n + 127) // 128) * 128


def make_gcn_kernel(num_layers, mxu_dtype):
    """Fused multi-layer GCN kernel for one graph (one grid step)."""

    def kernel(W_ref, x_ref, *refs):
        out_ref = refs[-1]
        w_refs = refs[:-1]                       # 2 refs per layer: A12, c12

        Wb = W_ref[0]                            # (N, N), resident across layers
        xb = x_ref[0]                            # (N, Fin), mxu_dtype
        y = None
        for l in range(num_layers):
            A12 = w_refs[2 * l][...]             # (Fin_pad, 2*Fout_pad)
            c12 = w_refs[2 * l + 1][...]         # (1, 2*Fout_pad), f32
            # fused feature_processor + dim_match (+ their feature_fusion share)
            hs = jnp.dot(xb, A12, preferred_element_type=jnp.float32) + c12
            Fp = hs.shape[-1] // 2               # lane-aligned (128-multiple) split
            h = hs[:, :Fp]
            skip = hs[:, Fp:]
            # graph propagation: W @ h  (the only N^2-scale matmul)
            prop = jnp.dot(Wb, h.astype(mxu_dtype),
                           preferred_element_type=jnp.float32)
            # ReLU (dropout rate 0 and quant stubs are identity in float mode)
            y = jnp.maximum(prop + skip, 0.0)
            xb = y.astype(mxu_dtype)             # feed next layer in operand dtype
        out_ref[0] = y.astype(out_ref.dtype)

    return kernel


def fold_layer(wp, bp, wd, bd, wf, bf, fin_pad, mxu_dtype):
    """One-time wrapper-side folding of one ConvLayer's three Linears into a
    single fused (and 128-lane padded) weight/bias pair."""
    Fout, Fin = wp.shape
    fout_pad = _pad128(Fout)
    wf1 = wf[:, :Fout]                           # multiplies x_propagated
    wf2 = wf[:, Fout:]                           # multiplies identity_proj
    A1 = (wf1 @ wp).T                            # (Fin, Fout)
    A2 = (wf2 @ wd).T                            # (Fin, Fout)
    c1 = bp @ wf1.T                              # (Fout,)
    c2 = bf + bd @ wf2.T                         # (Fout,)

    A1p = jnp.zeros((fin_pad, fout_pad), jnp.float32).at[:Fin, :Fout].set(A1)
    A2p = jnp.zeros((fin_pad, fout_pad), jnp.float32).at[:Fin, :Fout].set(A2)
    A12 = jnp.concatenate([A1p, A2p], axis=1).astype(mxu_dtype)  # (fin_pad, 2*fout_pad)
    c12 = (jnp.zeros((1, 2 * fout_pad), jnp.float32)
           .at[0, :Fout].set(c1)
           .at[0, fout_pad:fout_pad + Fout].set(c2))
    return A12, c12


def fold_params(params, input_dim, mxu_dtype):
    folded = []
    fin_pad = input_dim                          # layer 0 consumes raw x (no pad)
    for p in params:
        A12, c12 = fold_layer(*p, fin_pad=fin_pad, mxu_dtype=mxu_dtype)
        folded.append((A12, c12))
        fin_pad = A12.shape[1] // 2              # next layer's Fin_pad
    return folded


def gcn_net_pallas(W, x, params, use_bf16=True):
    """Full GCN_Net forward in a single pallas_call, batch on the grid."""
    B, N, _ = W.shape
    Fin = x.shape[-1]
    num_layers = len(params)
    fout_last = params[-1][0].shape[0]
    mxu_dtype = jnp.bfloat16 if use_bf16 else jnp.float32

    folded = fold_params(params, Fin, mxu_dtype)
    fout_pad_last = folded[-1][0].shape[1] // 2

    in_specs = [
        pl.BlockSpec((1, N, N), lambda b: (b, 0, 0)),      # per-graph W block
        pl.BlockSpec((1, N, Fin), lambda b: (b, 0, 0)),     # per-graph x block
    ]
    flat_weights = []
    for (A12, c12) in folded:
        in_specs.append(pl.BlockSpec(A12.shape, lambda b: (0, 0)))
        in_specs.append(pl.BlockSpec(c12.shape, lambda b: (0, 0)))
        flat_weights.extend([A12, c12])

    # Explicit scoped-VMEM budget: double-buffered W/x/out blocks + resident
    # weights + activation headroom (keeps v5e's 16 MiB / v6e-v7x's 32 MiB
    # defaults from being the limiter at larger N; capped at v7x's 64 MiB).
    w_it = jnp.dtype(mxu_dtype).itemsize
    working = 2 * (N * N + N * Fin) * w_it
    working += 2 * N * fout_pad_last * 4
    working += sum(int(a.size) * a.dtype.itemsize for pr in folded for a in pr)
    working += 8 * N * (2 * fout_pad_last) * 4
    vmem_limit = int(min(max(2 * working, 32 * 1024 * 1024), 64 * 1024 * 1024))

    out_padded = pl.pallas_call(
        make_gcn_kernel(num_layers, mxu_dtype),
        out_shape=jax.ShapeDtypeStruct((B, N, fout_pad_last), jnp.float32),
        grid_spec=pltpu.PrefetchScalarGridSpec(
            num_scalar_prefetch=0,
            grid=(B,),
            in_specs=in_specs,
            out_specs=pl.BlockSpec((1, N, fout_pad_last), lambda b: (b, 0, 0)),
        ),
        compiler_params=pltpu.CompilerParams(
            dimension_semantics=("parallel",),
            vmem_limit_bytes=vmem_limit,
        ),
    )(W.astype(mxu_dtype), x.astype(mxu_dtype), *flat_weights)

    return out_padded[..., :fout_last]           # strip lane padding


def init_params(key, input_dim, gnn_channels):
    """Deterministic synthetic parameters (shapes match the PyTorch module)."""
    params = []
    in_f = input_dim
    for out_f in gnn_channels:
        key, k1, k2, k3, k4 = jax.random.split(key, 5)
        wp = jax.random.normal(k1, (out_f, in_f), jnp.float32) * 0.2   # feature_processor
        bp = jax.random.normal(k2, (out_f,), jnp.float32) * 0.05
        if in_f != out_f:
            wd = jax.random.normal(k3, (out_f, in_f), jnp.float32) * 0.2  # dim_match Linear
            bd = jnp.zeros((out_f,), jnp.float32)
        else:
            wd = jnp.eye(out_f, dtype=jnp.float32)                        # nn.Identity
            bd = jnp.zeros((out_f,), jnp.float32)
        wf = jax.random.normal(k4, (out_f, 2 * out_f), jnp.float32) * 0.1  # feature_fusion
        bf = jnp.zeros((out_f,), jnp.float32)
        params.append((wp, bp, wd, bd, wf, bf))
        in_f = out_f
    return params


def gcn_net_reference(W, x, params):
    """Pure-JAX reference mirroring the PyTorch forward exactly (unfolded, f32)."""
    for (wp, bp, wd, bd, wf, bf) in params:
        h = jnp.einsum('bnf,of->bno', x, wp) + bp
        prop = jnp.einsum('bnm,bmo->bno', W, h)
        idp = jnp.einsum('bnf,of->bno', x, wd) + bd
        combined = jnp.concatenate([prop, idp], axis=-1)
        x = jnp.maximum(jnp.einsum('bnc,oc->bno', combined, wf) + bf, 0.0)
    return x


def gcn_folded_reference(W, x, folded, mxu_dtype, fout_last):
    """dtype-matched reference for the folded/padded algebra (bf16 check)."""
    Wb = W.astype(mxu_dtype)
    xb = x.astype(mxu_dtype)
    y = None
    for (A12, c12) in folded:
        hs = jnp.einsum('bnf,fo->bno', xb, A12,
                        preferred_element_type=jnp.float32) + c12
        Fp = hs.shape[-1] // 2
        h, skip = hs[..., :Fp], hs[..., Fp:]
        prop = jnp.einsum('bnm,bmo->bno', Wb, h.astype(mxu_dtype),
                          preferred_element_type=jnp.float32)
        y = jnp.maximum(prop + skip, 0.0)
        xb = y.astype(mxu_dtype)
    return y[..., :fout_last]


if __name__ == "__main__":
    # small shapes consistent with the module: max_size=4 -> N = 16 nodes
    B = 2
    max_size = 4
    N = max_size * max_size          # 16
    input_dim = 8
    gnn_channels = [16, 16]          # layer 0: dim_match Linear, layer 1: Identity

    key = jax.random.PRNGKey(0)
    kW, kx, kp = jax.random.split(key, 3)

    # adjacency (dense, row-normalized) and node features
    W = jax.random.uniform(kW, (B, N, N), jnp.float32)
    W = W / jnp.sum(W, axis=-1, keepdims=True)
    x = jax.random.normal(kx, (B, N, input_dim), jnp.float32)

    params = init_params(kp, input_dim, gnn_channels)
    ref = gcn_net_reference(W, x, params)

    # f32 operand path: exact-semantics check against the unfolded reference
    out_f32 = jax.block_until_ready(gcn_net_pallas(W, x, params, use_bf16=False))
    assert out_f32.shape == (B, N, gnn_channels[-1])
    assert jnp.allclose(out_f32, ref, atol=1e-4, rtol=1e-4), \
        "Pallas f32 output mismatch vs reference"

    # bf16 operand path (default): check against a dtype-matched folded reference
    # plus a loose sanity check against the f32 reference.
    out_bf16 = jax.block_until_ready(gcn_net_pallas(W, x, params, use_bf16=True))
    folded_bf16 = fold_params(params, input_dim, jnp.bfloat16)
    ref_bf16 = gcn_folded_reference(W, x, folded_bf16, jnp.bfloat16,
                                    gnn_channels[-1])
    assert jnp.allclose(out_bf16, ref_bf16, atol=1e-2, rtol=1e-2), \
        "Pallas bf16 output mismatch vs bf16-matched reference"
    assert jnp.allclose(out_bf16, ref, atol=5e-2, rtol=5e-2), \
        "Pallas bf16 output drifted too far from f32 reference"

    print("KERNEL_OK")
</pallas_src>

<mosaic_0001>
module attributes {stable_mosaic.version = 11 : i64} {
  func.func @kernel(%arg0: i32, %arg1: memref<1x16x16xf32, #tpu.memory_space<vmem>>, %arg2: memref<1x16x8xf32, #tpu.memory_space<vmem>>, %arg3: memref<8x256xf32, #tpu.memory_space<vmem>>, %arg4: memref<1x256xf32, #tpu.memory_space<vmem>>, %arg5: memref<128x256xf32, #tpu.memory_space<vmem>>, %arg6: memref<1x256xf32, #tpu.memory_space<vmem>>, %arg7: memref<1x16x128xf32, #tpu.memory_space<vmem>>) attributes {dimension_semantics = [#tpu.dimension_semantics<parallel>], iteration_bounds = array<i64: 2>, scalar_prefetch = 0 : i64, scratch_operands = 0 : i64, tpu.core_type = #tpu.core_type<tc>, window_params = [{transform_indices = @transform_0, window_bounds = array<i64: 1, 16, 16>}, {transform_indices = @transform_1, window_bounds = array<i64: 1, 16, 8>}, {pipeline_mode = #tpu.pipeline_mode<synchronous>, transform_indices = @transform_2, window_bounds = array<i64: 8, 256>}, {pipeline_mode = #tpu.pipeline_mode<synchronous>, transform_indices = @transform_3, window_bounds = array<i64: 1, 256>}, {pipeline_mode = #tpu.pipeline_mode<synchronous>, transform_indices = @transform_4, window_bounds = array<i64: 128, 256>}, {pipeline_mode = #tpu.pipeline_mode<synchronous>, transform_indices = @transform_5, window_bounds = array<i64: 1, 256>}, {transform_indices = @transform_6, window_bounds = array<i64: 1, 16, 128>}]} {
    %c0 = arith.constant 0 : index
    %c0_0 = arith.constant 0 : index
    %c0_1 = arith.constant 0 : index
    %0 = vector.load %arg1[%c0, %c0_0, %c0_1] : memref<1x16x16xf32, #tpu.memory_space<vmem>>, vector<1x16x16xf32>
    %1 = vector.shape_cast %0 : vector<1x16x16xf32> to vector<16x16xf32>
    %c0_2 = arith.constant 0 : index
    %c0_3 = arith.constant 0 : index
    %c0_4 = arith.constant 0 : index
    %2 = vector.load %arg2[%c0_2, %c0_3, %c0_4] : memref<1x16x8xf32, #tpu.memory_space<vmem>>, vector<1x16x8xf32>
    %3 = vector.shape_cast %2 : vector<1x16x8xf32> to vector<16x8xf32>
    %c0_5 = arith.constant 0 : index
    %c0_6 = arith.constant 0 : index
    %4 = vector.load %arg3[%c0_5, %c0_6] : memref<8x256xf32, #tpu.memory_space<vmem>>, vector<8x256xf32>
    %c0_7 = arith.constant 0 : index
    %c0_8 = arith.constant 0 : index
    %5 = vector.load %arg4[%c0_7, %c0_8] : memref<1x256xf32, #tpu.memory_space<vmem>>, vector<1x256xf32>
    %cst = arith.constant dense<0.000000e+00> : vector<16x256xf32>
    %6 = tpu.matmul %3, %4, %cst {dimension_numbers = #tpu.dot_dimension_numbers<[1], [0], [0], [1], [0, 0, 1, 1], [], []>} : vector<16x8xf32>, vector<8x256xf32>, vector<16x256xf32> -> vector<16x256xf32>
    %7 = vector.broadcast %5 : vector<1x256xf32> to vector<16x256xf32>
    %8 = arith.addf %6, %7 : vector<16x256xf32>
    %9 = vector.extract_strided_slice %8 {offsets = [0, 0], sizes = [16, 128], strides = [1, 1]} : vector<16x256xf32> to vector<16x128xf32>
    %10 = vector.extract_strided_slice %8 {offsets = [0, 128], sizes = [16, 128], strides = [1, 1]} : vector<16x256xf32> to vector<16x128xf32>
    %cst_9 = arith.constant dense<0.000000e+00> : vector<16x128xf32>
    %11 = tpu.matmul %1, %9, %cst_9 {dimension_numbers = #tpu.dot_dimension_numbers<[1], [0], [0], [1], [0, 0, 1, 1], [], []>} : vector<16x16xf32>, vector<16x128xf32>, vector<16x128xf32> -> vector<16x128xf32>
    %12 = arith.addf %11, %10 : vector<16x128xf32>
    %cst_10 = arith.constant 0.000000e+00 : f32
    %13 = vector.broadcast %cst_10 : f32 to vector<16x128xf32>
    %14 = arith.maximumf %12, %13 : vector<16x128xf32>
    %c0_11 = arith.constant 0 : index
    %c0_12 = arith.constant 0 : index
    %15 = vector.load %arg5[%c0_11, %c0_12] : memref<128x256xf32, #tpu.memory_space<vmem>>, vector<128x256xf32>
    %c0_13 = arith.constant 0 : index
    %c0_14 = arith.constant 0 : index
    %16 = vector.load %arg6[%c0_13, %c0_14] : memref<1x256xf32, #tpu.memory_space<vmem>>, vector<1x256xf32>
    %cst_15 = arith.constant dense<0.000000e+00> : vector<16x256xf32>
    %17 = tpu.matmul %14, %15, %cst_15 {dimension_numbers = #tpu.dot_dimension_numbers<[1], [0], [0], [1], [0, 0, 1, 1], [], []>} : vector<16x128xf32>, vector<128x256xf32>, vector<16x256xf32> -> vector<16x256xf32>
    %18 = vector.broadcast %16 : vector<1x256xf32> to vector<16x256xf32>
    %19 = arith.addf %17, %18 : vector<16x256xf32>
    %20 = vector.extract_strided_slice %19 {offsets = [0, 0], sizes = [16, 128], strides = [1, 1]} : vector<16x256xf32> to vector<16x128xf32>
    %21 = vector.extract_strided_slice %19 {offsets = [0, 128], sizes = [16, 128], strides = [1, 1]} : vector<16x256xf32> to vector<16x128xf32>
    %cst_16 = arith.constant dense<0.000000e+00> : vector<16x128xf32>
    %22 = tpu.matmul %1, %20, %cst_16 {dimension_numbers = #tpu.dot_dimension_numbers<[1], [0], [0], [1], [0, 0, 1, 1], [], []>} : vector<16x16xf32>, vector<16x128xf32>, vector<16x128xf32> -> vector<16x128xf32>
    %23 = arith.addf %22, %21 : vector<16x128xf32>
    %cst_17 = arith.constant 0.000000e+00 : f32
    %24 = vector.broadcast %cst_17 : f32 to vector<16x128xf32>
    %25 = arith.maximumf %23, %24 : vector<16x128xf32>
    %c0_18 = arith.constant 0 : index
    %c0_19 = arith.constant 0 : index
    %c0_20 = arith.constant 0 : index
    %26 = vector.load %arg7[%c0_18, %c0_19, %c0_20] : memref<1x16x128xf32, #tpu.memory_space<vmem>>, vector<1x16x128xf32>
    %27 = vector.shape_cast %26 : vector<1x16x128xf32> to vector<16x128xf32>
    %28 = vector.shape_cast %25 : vector<16x128xf32> to vector<1x16x128xf32>
    tpu.vector_store %arg7[%c0_18, %c0_19, %c0_20], %28 {strides = array<i32>} : memref<1x16x128xf32, #tpu.memory_space<vmem>>, vector<1x16x128xf32>,
    return
  }
  func.func @transform_0(%arg0: i32) -> (i32, i32, i32) {
    %c0_i32 = arith.constant 0 : i32
    %c0_i32_0 = arith.constant 0 : i32
    %c0_i32_1 = arith.constant 0 : i32
    return %arg0, %c0_i32, %c0_i32_0 : i32, i32, i32
  }
  func.func @transform_1(%arg0: i32) -> (i32, i32, i32) {
    %c0_i32 = arith.constant 0 : i32
    %c0_i32_0 = arith.constant 0 : i32
    %c0_i32_1 = arith.constant 0 : i32
    return %arg0, %c0_i32, %c0_i32_0 : i32, i32, i32
  }
  func.func @transform_2(%arg0: i32) -> (i32, i32) {
    %c0_i32 = arith.constant 0 : i32
    %c0_i32_0 = arith.constant 0 : i32
    %c0_i32_1 = arith.constant 0 : i32
    return %c0_i32, %c0_i32_0 : i32, i32
  }
  func.func @transform_3(%arg0: i32) -> (i32, i32) {
    %c0_i32 = arith.constant 0 : i32
    %c0_i32_0 = arith.constant 0 : i32
    %c0_i32_1 = arith.constant 0 : i32
    return %c0_i32, %c0_i32_0 : i32, i32
  }
  func.func @transform_4(%arg0: i32) -> (i32, i32) {
    %c0_i32 = arith.constant 0 : i32
    %c0_i32_0 = arith.constant 0 : i32
    %c0_i32_1 = arith.constant 0 : i32
    return %c0_i32, %c0_i32_0 : i32, i32
  }
  func.func @transform_5(%arg0: i32) -> (i32, i32) {
    %c0_i32 = arith.constant 0 : i32
    %c0_i32_0 = arith.constant 0 : i32
    %c0_i32_1 = arith.constant 0 : i32
    return %c0_i32, %c0_i32_0 : i32, i32
  }
  func.func @transform_6(%arg0: i32) -> (i32, i32, i32) {
    %c0_i32 = arith.constant 0 : i32
    %c0_i32_0 = arith.constant 0 : i32
    %c0_i32_1 = arith.constant 0 : i32
    return %arg0, %c0_i32, %c0_i32_0 : i32, i32, i32
  }
}

</mosaic_0001>

<bundles_post_ra>
// kernel: tpu_custom_call.1
= control target key start
LH: loop header
LB: loop body
LE: loop exit
PB: predicated region body
PF: predicated region fallthrough
CT: control target
= control target key end

     0   :  { %11 = vsyncpa [#allocation3], 0  ;;  %s1220_s0 = inlined_call_operand.vmem [shape: f32[2,16,16], index: 0, kind: input, shape index: {}]   ;;  %s1221_s1 = inlined_call_operand.vmem [shape: f32[2,16,8], index: 1, kind: input, shape index: {}]   ;;  %s1222_s2 = inlined_call_operand.vmem [shape: f32[8,256], index: 2, kind: input, shape index: {}]   ;;  %s1223_s3 = inlined_call_operand.vmem [shape: f32[1,256], index: 3, kind: input, shape index: {}]   ;;  %s1224_s4 = inlined_call_operand.hbm [shape: f32[128,256], index: 4, kind: input, shape index: {}]   ;;  %s1225_s5 = inlined_call_operand.vmem [shape: f32[1,256], index: 5, kind: input, shape index: {}]   ;;  %s1226_s6 = inlined_call_operand.hbm [shape: f32[2,16,128], index: 6, kind: output, shape index: {}]  }
   0x1   :  { %12 = vsyncpa [#allocation4], 0 }
   0x2   :  { %14 = vsyncpa [#allocation4 + $0x1], 0  ;;  %s1051_s21 = smov 0   ;;  %s1053_s22 = smov 0  }
   0x3   :  { %s1055_s23 = smov 0   ;;  %s1057_s24 = smov 0  }
   0x4 LB: > { %s1072_s25 = sadd.s32 4294967295, %s1007_s24   ;;  %s771_s26 = sadd.s32 4294967294, %s1007_s24   ;;  %s1007_s24 = sphi %s1057_s24, %s1242_s24   ;;  %s1003_s23 = sphi %s1055_s23, %s1241_s23   ;;  %s999_s22 = sphi %s1053_s22, %s1240_s22   ;;  %s995_s21 = sphi %s1051_s21, %s1239_s21  }
   0x5   : > { %s1076_s27 = sadd.s32 1, %s1007_s24   ;;  %s163_s28 = sadd.s32 1, %s1003_s23 }
   0x6   : > { %s160_s29 = ssub.s32 %s1007_s24, %s1076_s27  ;;  %p173_p0 = scmp.ne.s32.totalorder %s1003_s23, %s999_s22 }
   0x7   : > { %p161_p1 = scmp.eq.s32.totalorder %s160_s29, 0  ;;  %p174_p2 = scmp.eq.s32.totalorder %s1072_s25, 1 }
   0x8   : > { %p179_p3 = scmp.ne.s32.totalorder %s999_s22, %s995_s21  ;;  %p180_p4 = scmp.eq.s32.totalorder %s771_s26, 1 }
   0x9   : > { %s1087_s30 = scalar_select %p161_p1, %s1003_s23, %s163_s28  }
   0xa   : > { %p1089_p5 = por %p174_p2, %p173_p0  ;;  %p1093_p6 = por %p180_p4, %p179_p3 }
   0xb   : > { %p772_p7 = scmp.ge.s32.totalorder %s1007_s24, 1  ;;  %p187_p8 = scmp.lt.s32.totalorder %s1007_s24, 3 }
   0xc   : > { %s1230_s7 = scalar_select %p1089_p5, 1, 0 }
   0xd   : > { %s1231_s8 = scalar_select %p1093_p6, 1, 0 }
   0xe   : > { %p1227_p9 = scmp.eq.s32.totalorder %s1072_s25, 0  ;;  %p1100_p10 = pnand %p772_p7, %p187_p8 }
   0xf   : > { %s1009_s10 = smov [#allocation2]   ;;  %s913_s15 = scalar_lea.hbm %s1224_s4, 4096 }
  0x10   : > { %s1232_s9 = scalar_select %p1100_p10, 1, 0 }
  0x11   : > { %s205_s11 = sshll.u32 %s1009_s10, 4  ;;  %p864_p11 = pneg %p1100_p10  ;;  %s206_s11 = int_to_ptr.vmem [resolvable:$true] %s205_s11 }
  0x12   : > { %p914_p13 = scmp.ne.s32.totalorder %s1224_s4, %s913_s15  ;;  %p920_p3 = scmp.lt.u32.totalorder %s913_s15, %s1224_s4 }
  0x13   : > { %p1108_p12 = pnand %p1227_p9, %p864_p11 }
  0x15   : > { %p915_p0 = pneg %p1108_p12 }
  0x17   : > { %p916_p1 = pnand %p915_p0, %p914_p13 }
  0x19   : > { %p917_p2 = pneg %p916_p1 }
  0x1b   : > { %p922_p4 = pnand %p920_p3, %p917_p2 }
  0x1d   : > { %925 = shalt.err (!%p922_p4)
}
  0x1e   : > { %s926_s20 = scalar_lea.vmem %s206_s11, 4096  ;;  %p934_p9 = scmp.lt.s32.totalorder %s206_s11, %s206_s11 }
  0x1f   : > { %p927_p7 = scmp.ne.s32.totalorder %s206_s11, %s926_s20  ;;  %p935_p6 = scmp.lt.s32.totalorder %s926_s20, %s926_s20 }
  0x21   : > { %p929_p8 = pnand %p927_p7, %p915_p0  ;;  %p936_p5 = por %p935_p6, %p934_p9 }
  0x23   : > { %p930_p11 = pneg %p929_p8 }
  0x25   : > { %p937_p10 = pnand %p936_p5, %p930_p11 }
  0x27   : > { %940 = shalt.err (!%p937_p10)
}
  0x28   : > { %s1010_s26 = smov 256   ;;  %s1011_s28 = smov 16  }
  0x29   : > { %867 = dma.hbm_to_vmem [thread:$0]  (!%p1108_p12), %s1224_s4, 4096, %s206_s11, [#allocation3], %s1010_s26, %s1010_s26, %s1011_s28  }
  0x2a   : > { %p1234_p13 = scmp.ne.s32.totalorder %s1232_s9, 0 }
  0x2b   : > { %p1235_p1 = scmp.eq.s32.totalorder (!%p1234_p13), %s1072_s25, 0 }
  0x2c   : > { %240 = sbr.rel (%p1234_p13) target bundleno = 956 (0x3bc), region = 44 }
  0x33   : > { %986 = dma.done.wait (%p1235_p1), [#allocation3], 4096   ;;  %p1236_p0 = pmov %p1235_p1 }
  0x34   : > { %p275_p5 = scmp.lt.s32.totalorder %s1072_s25, 1  ;;  %v1012_v0 = vmov 0.0   ;;  %v290_v1 = vld [vmem:[%s1222_s2 + $0x8] sm:$0xff]  ;;  %v289_v2 = vld [vmem:[%s1222_s2] sm:$0xff]  ;;  %vm303_vm0 = vcmask 64512   ;;  %vm387_vm1 = vcmask 130048   ;;  %v293_v48 = vlaneseq }
  0x35   : > { %988 = vsyncadd (%p1236_p0), [#allocation3], 4294963200  ;;  %374 = vmatprep.mubr.f32.mxu1 %v1012_v0  ;;  %579 = vmatprep.mubr.f32.mxu0 %v1012_v0  ;;  %v472_v6 = vld [vmem:[#allocation2 + $0x8] sm:$0xff]  ;;  %v474_v7 = vld [vmem:[#allocation2 + $0x18] sm:$0xff]  ;;  %s795_s15 = sshll.u32 %s1072_s25, 8  ;;  %p1237_p9 = scmp.ne.s32.totalorder %s1230_s7, 0 }
  0x36   : > { %s276_s12 = scalar_select %p275_p5, %s1072_s25, 1  ;;  %310 = vmatprep.subr.mxu1 %v290_v1  ;;  %v471_v8 = vld [vmem:[#allocation2] sm:$0xff]  ;;  %v822_v9 = vpack.c.bf16 %v474_v7, %v472_v6  ;;  %v473_v10 = vld [vmem:[#allocation2 + $0x10] sm:$0xff]  ;;  %v476_v11 = vld [vmem:[#allocation2 + $0x28] sm:$0xff]  ;;  %v294_v49 = vshrl.u32 %v293_v48, 7 }
  0x37   : > { %311 = vmatpush1.msra.mxu1 %v289_v2  ;;  %v478_v12 = vld [vmem:[#allocation2 + $0x38] sm:$0xff]  ;;  %v824_v13 = vpack.c.bf16 %v473_v10, %v471_v8  ;;  %v475_v15 = vld [vmem:[#allocation2 + $0x20] sm:$0xff]  ;;  %v477_v16 = vld [vmem:[#allocation2 + $0x30] sm:$0xff]  ;;  %s1177_s18 = scalar_lea.hbm %s1226_s6, %s795_s15  ;;  %s1013_s20 = smov [#allocation5]  }
  0x38   : > { %s793_s13 = sshll.u32 %s276_s12, 4  ;;  %v826_v14 = vpack.c.bf16 %v478_v12, %v476_v11  ;;  %v480_v17 = vld [vmem:[#allocation2 + $0x48] sm:$0xff]  ;;  %823 = vmatprep.subr.bf16.mxu0 %v822_v9  ;;  %v482_v18 = vld [vmem:[#allocation2 + $0x58] sm:$0xff]  ;;  %v828_v19 = vpack.c.bf16 %v477_v16, %v475_v15  ;;  %v479_v21 = vld [vmem:[#allocation2 + $0x40] sm:$0xff]  ;;  %v295_v50 = vsub.s32 0, %v294_v49 }
  0x39   : > { %s284_s9 = scalar_lea.vmem %s1221_s1, %s793_s13  ;;  %s1151_s26 = scalar_lea.vmem %s1220_s0, %s793_s13  ;;  %825 = vmatpush1.bf16.msra.mxu0 %v824_v13  ;;  %v830_v20 = vpack.c.bf16 %v482_v18, %v480_v17  ;;  %v481_v22 = vld [vmem:[#allocation2 + $0x50] sm:$0xff]  ;;  %v484_v23 = vld [vmem:[#allocation2 + $0x68] sm:$0xff]  ;;  %v486_v24 = vld [vmem:[#allocation2 + $0x78] sm:$0xff] }
  0x3a   : > { %v287_v3 = vld [vmem:[%s284_s9] sm:$0xff]  ;;  %v288_v4 = vld [vmem:[%s284_s9 + $0x8] sm:$0xff]  ;;  %827 = vmatprep.subr.bf16.mxu0 %v826_v14  ;;  %v832_v25 = vpack.c.bf16 %v481_v22, %v479_v21  ;;  %v834_v26 = vpack.c.bf16 %v486_v24, %v484_v23  ;;  %v485_v28 = vld [vmem:[#allocation2 + $0x70] sm:$0xff]  ;;  %s272_s13 = sand.u32 1, %s999_s22  }
  0x3b   : > { %782 = vmatmul.mubr.msk.f32.vlgmr.msra.gmra.mrb[0].mxu1 %vm303_vm0, %v287_v3  ;;  %v1154_v5 = vld [vmem:[%s1151_s26] sm:$0xff]  ;;  %v488_v29 = vld [vmem:[#allocation2 + $0x88] sm:$0xff]  ;;  %v490_v30 = vld [vmem:[#allocation2 + $0x98] sm:$0xff]  ;;  %s777_s11 = sshll.u32 %s272_s13, 4  ;;  %s1179_s19 = scalar_lea.sflag [#allocation4], %s272_s13 }
  0x3c   : > { %380 = vmatprep.mubr.f32.mxu1 %v1012_v0  ;;  %v483_v27 = vld [vmem:[#allocation2 + $0x60] sm:$0xff]  ;;  %v838_v32 = vpack.c.bf16 %v490_v30, %v488_v29  ;;  %v489_v34 = vld [vmem:[#allocation2 + $0x90] sm:$0xff]  ;;  %v492_v35 = vld [vmem:[#allocation2 + $0xa8] sm:$0xff]  ;;  %s274_s14 = scalar_lea.vmem [#allocation5], %s777_s11 }
  0x3d   : > { %829 = vmatpush1.bf16.msra.mxu0 %v828_v19  ;;  %v836_v31 = vpack.c.bf16 %v485_v28, %v483_v27  ;;  %v487_v33 = vld [vmem:[#allocation2 + $0x80] sm:$0xff]  ;;  %v494_v36 = vld [vmem:[#allocation2 + $0xb8] sm:$0xff]  ;;  %v493_v40 = vld [vmem:[#allocation2 + $0xb0] sm:$0xff]  ;;  %s685_s9 = sshll.u32 %s274_s14, 4  ;;  %s1172_s9 = int_to_ptr.vmem [resolvable:$true] %s685_s9 }
  0x3e   : > { %831 = vmatprep.subr.bf16.mxu0 %v830_v20  ;;  %v840_v37 = vpack.c.bf16 %v489_v34, %v487_v33  ;;  %v842_v38 = vpack.c.bf16 %v494_v36, %v492_v35  ;;  %v491_v39 = vld [vmem:[#allocation2 + $0xa0] sm:$0xff]  ;;  %v496_v41 = vld [vmem:[#allocation2 + $0xc8] sm:$0xff]  ;;  %v498_v42 = vld [vmem:[#allocation2 + $0xd8] sm:$0xff]  ;;  %s941_s25 = scalar_lea.vmem %s1172_s9, 256 }
  0x3f   : > { %783 = vmatmul.mubr.msk.f32.gmra.mrb[2].mxu1 %vm303_vm0, %v288_v4  ;;  %v844_v43 = vpack.c.bf16 %v493_v40, %v491_v39  ;;  %v846_v44 = vpack.c.bf16 %v498_v42, %v496_v41  ;;  %v495_v45 = vld [vmem:[#allocation2 + $0xc0] sm:$0xff]  ;;  %v497_v46 = vld [vmem:[#allocation2 + $0xd0] sm:$0xff]  ;;  %v286_v60 = vld [vmem:[%s1151_s26 + $0x8] sm:$0xff]  ;;  %v299_v4 = vsub.s32 1, %v294_v49  ;;  %p942_p6 = scmp.ne.s32.totalorder %s1172_s9, %s941_s25  ;;  %s945_s26 = sshll.u32 %s1013_s20, 4  ;;  %s946_s26 = int_to_ptr.vmem [resolvable:$false] %s945_s26 }
  0x40   : > { %808 = vmatprep.mubr.msk.f32.mxu1 %vm387_vm1, %v1154_v5  ;;  %v848_v47 = vpack.c.bf16 %v497_v46, %v495_v45  ;;  %v291_v51 = vld [vmem:[%s1223_s3] sm:$0x3]  ;;  %v500_v61 = vld [vmem:[#allocation2 + $0xe8] sm:$0xff]  ;;  %v502_v62 = vld [vmem:[#allocation2 + $0xf8] sm:$0xff]  ;;  %s947_s28 = scalar_lea.vmem %s946_s26, 512  ;;  %p948_p2 = scmp.lt.s32.totalorder %s1172_s9, %s946_s26 }
  0x41   : > { %833 = vmatpush1.bf16.msra.mxu0 %v832_v25  ;;  %v296_v53 = vrot.slane %v291_v51, %v295_v50  ;;  %v850_v63 = vpack.c.bf16 %v502_v62, %v500_v61  ;;  %v499_v1 = vld [vmem:[#allocation2 + $0xe0] sm:$0xff]  ;;  %v501_v2 = vld [vmem:[#allocation2 + $0xf0] sm:$0xff]  ;;  %v300_v6 = vrot.slane %v291_v51, %v299_v4  ;;  %p943_p10 = pnand %p942_p6, %p1237_p9  ;;  %p949_p3 = scmp.lt.s32.totalorder %s947_s28, %s941_s25 }
  0x42   : > { %835 = vmatprep.subr.bf16.mxu0 %v834_v26  ;;  %v852_v3 = vpack.c.bf16 %v501_v2, %v499_v1  ;;  %v503_v14 = vld [vmem:[%s1225_s5] sm:$0x3] }
  0x43   : > { %v508_v16 = vrot.slane %v503_v14, %v295_v50  ;;  %p944_p12 = pneg %p943_p10  ;;  %p950_p4 = por %p949_p3, %p948_p2 }
  0x45   : > { %837 = vmatpush1.bf16.msra.mxu0 %v836_v31  ;;  %p951_p7 = pnand %p950_p4, %p944_p12 }
  0x46   : > { %839 = vmatprep.subr.bf16.mxu0 %v838_v32 }
  0x49   : > { %841 = vmatpush1.bf16.msra.mxu0 %v840_v37 }
  0x4a   : > { %843 = vmatprep.subr.bf16.mxu0 %v842_v38 }
  0x4d   : > { %845 = vmatpush1.bf16.msra.mxu0 %v844_v43 }
  0x4e   : > { %847 = vmatprep.subr.bf16.mxu0 %v846_v44 }
  0x51   : > { %849 = vmatpush1.bf16.msra.mxu0 %v848_v47 }
  0x52   : > { %851 = vmatprep.subr.bf16.mxu0 %v850_v63 }
  0x55   : > { %853 = vmatpush1.bf16.msra.mxu0 %v852_v3 }
 0x10e   : > { %v376_v52 = vpop.f32.mrb[0].mxu1 }
 0x10f   : > { %v378_v54 = vpop.f32.mrb[1].mxu1  ;;  %v377_v56 = vadd.f32 %v376_v52, %v296_v53 }
 0x110   : > { %v379_v8 = vadd.f32 %v378_v54, %v300_v6 }
 0x112   : > { %v382_v55 = vpop.f32.mrb[2].mxu1 }
 0x113   : > { %v383_v57 = vadd.f32 %v382_v55, %v296_v53  ;;  %v384_v58 = vpop.f32.mrb[3].mxu1 }
 0x114   : > { %v385_v7 = vadd.f32 %v384_v58, %v300_v6 }
 0x115   : > { %v818_v59 = vpack.c.bf16 %v383_v57, %v377_v56 }
 0x117   : > { %819 = vmatprep.subr.bf16.mxu1 %v818_v59 }
 0x118   : > { %821 = vmatpush3.bf16.msra.mxu1 %v818_v59 }
 0x11b   : > { %809 = vmatmul.mubr.msk.f32.vlgmr.msra.gmra.mrb[4].mxu1 %vm387_vm1, %v286_v60 }
 0x11c   : > { %815 = vmatprep.mubr.msk.f32.mxu1 %vm387_vm1, %v1154_v5 }
 0x1ee   : > { %v810_v9 = vpop.f32.mrb[4].mxu1 }
 0x1ef   : > { %v466_v10 = vadd.f32 %v810_v9, %v385_v7  ;;  %v460_v11 = vpop.f32.mrb[5].mxu1 }
 0x1f0   : > { %v461_v12 = vadd.f32 %v460_v11, %v379_v8 }
 0x1f1   : > { %v470_v5 = vmax.f32 %v466_v10, 0.0 }
 0x1f2   : > { %v469_v13 = vmax.f32 %v461_v12, 0.0 }
 0x1f4   : > { %580 = vmatmul.mubr.f32.vlgmr.msra.gmra.mrb[0].mxu0 %v469_v13 }
 0x1f5   : > { %585 = vmatprep.mubr.f32.mxu0 %v1012_v0  ;;  %v512_v0 = vrot.slane %v503_v14, %v299_v4 }
 0x1f8   : > { %586 = vmatmul.mubr.f32.gmra.mrb[2].mxu0 %v470_v5 }
 0x2c7   : > { %v581_v15 = vpop.f32.mrb[0].mxu0 }
 0x2c8   : > { %v583_v17 = vpop.f32.mrb[1].mxu0  ;;  %v582_v19 = vadd.f32 %v581_v15, %v508_v16 }
 0x2c9   : > { %v584_v24 = vadd.f32 %v583_v17, %v512_v0 }
 0x2cb   : > { %v587_v18 = vpop.f32.mrb[2].mxu0 }
 0x2cc   : > { %v588_v20 = vadd.f32 %v587_v18, %v508_v16  ;;  %v589_v21 = vpop.f32.mrb[3].mxu0 }
 0x2cd   : > { %v590_v23 = vadd.f32 %v589_v21, %v512_v0 }
 0x2ce   : > { %v854_v22 = vpack.c.bf16 %v588_v20, %v582_v19 }
 0x2d0   : > { %855 = vmatprep.subr.bf16.mxu1 %v854_v22 }
 0x2d1   : > { %857 = vmatpush3.bf16.msra.mxu1 %v854_v22 }
 0x2d4   : > { %816 = vmatmul.mubr.msk.f32.vlgmr.msra.gmra.mrb[6].mxu1 %vm387_vm1, %v286_v60 }
 0x3a7   : > { %v817_v25 = vpop.f32.mrb[6].mxu1 }
 0x3a8   : > { %v664_v26 = vadd.f32 %v817_v25, %v590_v23  ;;  %v658_v27 = vpop.f32.mrb[7].mxu1 }
 0x3a9   : > { %v659_v28 = vadd.f32 %v658_v27, %v584_v24 }
 0x3aa   : > { %v668_v29 = vmax.f32 %v664_v26, 0.0 }
 0x3ab   : > { %v667_v30 = vmax.f32 %v659_v28, 0.0 }
 0x3ac   : > { %670 = vst [vmem:[%s274_s14 + $0x8] sm:$0xff] %v668_v29 }
 0x3ad   : > { %669 = vst [vmem:[%s274_s14] sm:$0xff] %v667_v30 }
 0x3ae   : > { %954 = shalt.err (!%p951_p7)
}
 0x3af   : > { %s955_s29 = scalar_lea.hbm %s1177_s18, 256  ;;  %s959_s13 = scalar_lea.hbm %s1226_s6, 512 }
 0x3b0   : > { %p956_p8 = scmp.ne.s32.totalorder %s1177_s18, %s955_s29  ;;  %p960_p1 = scmp.lt.u32.totalorder %s1177_s18, %s1226_s6 }
 0x3b1   : > { %p961_p0 = scmp.lt.u32.totalorder %s959_s13, %s955_s29  ;;  %p963_p6 = scmp.lt.u32.totalorder %s955_s29, %s1177_s18 }
 0x3b2   : > { %p957_p11 = pnand %p956_p8, %p1237_p9 }
 0x3b3   : > { %p962_p5 = por %p961_p0, %p960_p1 }
 0x3b4   : > { %p958_p13 = pneg %p957_p11 }
 0x3b5   : > { %p964_p10 = por %p963_p6, %p962_p5 }
 0x3b7   : > { %p965_p12 = pnand %p964_p10, %p958_p13 }
 0x3b9   : > { %968 = shalt.err (!%p965_p12)
}
 0x3ba   : > { %s1014_s15 = smov 128   ;;  %s1015_s16 = smov 8  }
 0x3bb   : > { %862 = dma.vmem_to_hbm [thread:$0]  (%p1237_p9), %s1172_s9, 256, %s1177_s18, %s1179_s19, %s1014_s15, %s1014_s15, %s1015_s16  }
 0x3bc PF: > { %p874_p2 = scmp.ge.s32.totalorder %s1007_s24, 2  ;;  %s700_s17 = sand.u32 1, %s995_s21  }
 0x3bd   : > { %p1238_p3 = scmp.ne.s32.totalorder %s1231_s8, 0  ;;  %s701_s25 = scalar_lea.sflag [#allocation4], %s700_s17 }
 0x3bf   : > { %p869_p4 = pnand %p874_p2, %p1238_p3 }
 0x3c1   : > { %990 = dma.done.wait (!%p869_p4), %s701_s25, 256  }
 0x3c2   : > { %992 = vsyncadd (!%p869_p4), %s701_s25, 4294967040  ;;  %p17_p7 = scmp.ge.s32.totalorder %s1076_s27, 4   ;;  %s1239_s21 = smov %s999_s22 }
 0x3c3   : > { %s1240_s22 = smov %s1003_s23  ;;  %s1241_s23 = smov %s1087_s30 }
 0x3c4   : > { %s1242_s24 = smov %s1076_s27  ;;  %19 = sbr.rel (!%p17_p7) target bundleno = 4 (0x4), region = 87 }
 0x3cb   :  { %706 = vsyncpa [#allocation3], 1 }
 0x3cc   :  { %708 = vsyncpa [#allocation3 + $0x1], 1 }
 0x3cd   :  { %709 = vsyncpa [#allocation4], 1 }
 0x3ce   :  { %711 = vsyncpa [#allocation4 + $0x1], 1 }

</bundles_post_ra>
